<compile_context>
chip_gen: v5e
topology: v5e:2x2
jax: 0.10.0
libtpu: 0.0.40
codegen_flags: <defaults>
</compile_context>

<pallas_src>
import jax
import jax.numpy as jnp
from jax.experimental import pallas as pl
from jax.experimental.pallas import tpu as pltpu


def _round_up(x: int, m: int) -> int:
    return ((x + m - 1) // m) * m


def _choose_tb(B: int, block_batch: int) -> int:
    """Batch tile: multiple of 8, MXU-friendly when large, and guaranteeing
    >= 2 grid steps for large batches (v7x megacore)."""
    B8 = _round_up(B, 8)
    if B8 <= 8:
        return 8
    tb = min(_round_up(block_batch, 8), _round_up((B8 + 1) // 2, 8))
    for g in (256, 128):          # v6e/v7x MXU prefers M in 256 granules
        if tb >= g:
            tb = (tb // g) * g
            break
    return max(tb, 8)


def _kernel(x_ref, wc_ref, bc_ref, w1_ref, b1_ref, w2_ref, b2_ref, out_ref):
    """Fused (conv1d+relu+flatten) -> fc1+relu -> fc2, all as MXU matmuls."""
    x = x_ref[...]                                                  # (TB, L_pad)

    # Conv1d + channel-major flatten as one Toeplitz matmul.
    a = jnp.dot(x, wc_ref[...], preferred_element_type=jnp.float32)  # (TB, F_pad)
    a = jnp.maximum(a + bc_ref[...], 0.0)

    # fc1 + ReLU.
    h1 = jnp.dot(a, w1_ref[...], preferred_element_type=jnp.float32)  # (TB, H_pad)
    h1 = jnp.maximum(h1 + b1_ref[...], 0.0)

    # fc2.
    out = jnp.dot(h1, w2_ref[...], preferred_element_type=jnp.float32)  # (TB, OUT_pad)
    out_ref[...] = (out + b2_ref[...]).astype(out_ref.dtype)


def cnn_tsnet_forward(x_b1l, params, *, kernel_size, stride=1, padding=0,
                      block_batch=512):
    """x_b1l: (B, 1, L) float32, matching the PyTorch NCL convention.

    params = (wconv (C_out, K)  [= Conv1d.weight squeezed],
              bconv (C_out,),
              w1 (F, 50)        [= fc1.weight.T],
              b1 (50,),
              w2 (50, OUT)      [= fc2.weight.T],
              b2 (OUT,))
    """
    assert stride == 1 and padding == 0, "kernel specialized for stride=1, padding=0"
    wconv, bconv, w1, b1, w2, b2 = params
    B, Cin, L = x_b1l.shape
    assert Cin == 1
    C_out, K = wconv.shape
    assert K == kernel_size
    L_out = (L + 2 * padding - (K - 1) - 1) // stride + 1
    F = C_out * L_out
    hidden = w1.shape[1]
    assert w1.shape == (F, hidden)
    OUT = w2.shape[1]

    # ---- Aligned / padded sizes -------------------------------------------
    L_PAD = _round_up(L, 8)          # contraction dim of first matmul (sublanes of W_conv)
    F_PAD = _round_up(F, 128)        # flattened conv features, lane-dense
    H_PAD = _round_up(hidden, 128)   # fc1 hidden, lane-dense
    OUT_PAD = _round_up(OUT, 128)    # output, lane-dense (unmasked stores)

    TB = _choose_tb(B, block_batch)
    B_pad = _round_up(_round_up(B, 8), TB)
    grid = (B_pad // TB,)

    f32 = jnp.float32

    # ---- Trace-time parameter packing --------------------------------------
    # Input: squeeze channel axis, pad batch + length with zeros.
    x_bl = x_b1l.reshape(B, L).astype(f32)
    x_bl = jnp.pad(x_bl, ((0, B_pad - B), (0, L_PAD - L)))

    # Toeplitz conv weight: W_conv[l, c*L_out + j] = wconv[c, l-j] if 0<=l-j<K.
    wconv_f = wconv.astype(f32)                               # (C_out, K)
    l_idx = jnp.arange(L)[:, None]                            # (L, 1)
    j_idx = jnp.arange(L_out)[None, :]                        # (1, L_out)
    k_idx = l_idx - j_idx                                     # (L, L_out)
    valid = (k_idx >= 0) & (k_idx < K)
    k_cl = jnp.clip(k_idx, 0, K - 1)
    w_per_chan = jnp.where(valid[None, :, :], wconv_f[:, k_cl], 0.0)   # (C_out, L, L_out)
    W_conv = jnp.transpose(w_per_chan, (1, 0, 2)).reshape(L, F)        # channel-major
    W_conv = jnp.pad(W_conv, ((0, L_PAD - L), (0, F_PAD - F)))         # (L_PAD, F_PAD)
    bconv_flat = jnp.repeat(bconv.astype(f32), L_out).reshape(1, F)    # channel-major
    bconv_flat = jnp.pad(bconv_flat, ((0, 0), (0, F_PAD - F)))         # (1, F_PAD)

    # fc1 / fc2: zero-pad contraction and output dims (zeros preserve results).
    w1_p = jnp.pad(w1.astype(f32), ((0, F_PAD - F), (0, H_PAD - hidden)))
    b1_p = jnp.pad(b1.reshape(1, hidden).astype(f32), ((0, 0), (0, H_PAD - hidden)))
    w2_p = jnp.pad(w2.astype(f32), ((0, H_PAD - hidden), (0, OUT_PAD - OUT)))
    b2_p = jnp.pad(b2.reshape(1, OUT).astype(f32), ((0, 0), (0, OUT_PAD - OUT)))

    # ---- Cost estimate (helps XLA schedule around the custom call) ---------
    flops = 2 * B_pad * (L_PAD * F_PAD + F_PAD * H_PAD + H_PAD * OUT_PAD)
    bytes_accessed = 4 * (B_pad * L_PAD + B_pad * OUT_PAD
                          + L_PAD * F_PAD + F_PAD * H_PAD + H_PAD * OUT_PAD
                          + F_PAD + H_PAD + OUT_PAD)
    cost = pl.CostEstimate(flops=flops, transcendentals=0,
                           bytes_accessed=bytes_accessed)

    # TODO(synk): for scaled-up F (tens of thousands) on v7x, single-buffer the
    # constant-index weight specs (pipeline_mode=pl.Buffered(1)) / raise
    # vmem_limit_bytes; negligible at these sizes.
    out_padded = pl.pallas_call(
        _kernel,
        out_shape=jax.ShapeDtypeStruct((B_pad, OUT_PAD), f32),
        grid=grid,
        in_specs=[
            pl.BlockSpec((TB, L_PAD), lambda i: (i, 0)),          # x tile
            pl.BlockSpec((L_PAD, F_PAD), lambda i: (0, 0)),       # Toeplitz conv W
            pl.BlockSpec((1, F_PAD), lambda i: (0, 0)),           # conv bias (flat)
            pl.BlockSpec((F_PAD, H_PAD), lambda i: (0, 0)),       # fc1 W
            pl.BlockSpec((1, H_PAD), lambda i: (0, 0)),           # fc1 b
            pl.BlockSpec((H_PAD, OUT_PAD), lambda i: (0, 0)),     # fc2 W
            pl.BlockSpec((1, OUT_PAD), lambda i: (0, 0)),         # fc2 b
        ],
        out_specs=pl.BlockSpec((TB, OUT_PAD), lambda i: (i, 0)),
        compiler_params=pltpu.CompilerParams(
            dimension_semantics=("parallel",)),
        cost_estimate=cost,
    )(x_bl, W_conv, bconv_flat, w1_p, b1_p, w2_p, b2_p)

    return out_padded[:B, :OUT]


def reference_forward(x_b1l, params, *, kernel_size):
    """Plain-JAX reference, mirrors the PyTorch module exactly."""
    wconv, bconv, w1, b1, w2, b2 = params
    B, _, L = x_b1l.shape
    C_out, K = wconv.shape
    L_out = L - (K - 1)
    x = x_b1l.reshape(B, L)
    conv = jnp.stack(
        [sum(x[:, k:k + L_out] * wconv[c, k] for k in range(K)) + bconv[c]
         for c in range(C_out)],
        axis=1,
    )                                                      # (B, C_out, L_out)
    a = jnp.maximum(conv, 0.0).reshape(B, C_out * L_out)   # flatten(start_dim=1)
    h1 = jnp.maximum(a @ w1 + b1, 0.0)
    return h1 @ w2 + b2


if __name__ == "__main__":
    # Small shapes consistent with the module: B=2, in_channels=1, input_size=16,
    # kernel_size=3, out_channels=2, output=2  ->  L_out=14, flatten=28.
    B, L, K, C_OUT, OUT = 2, 16, 3, 2, 2
    L_OUT = L - (K - 1)
    F = C_OUT * L_OUT

    key = jax.random.PRNGKey(0)
    kx, k1, k2, k3, k4, k5, k6 = jax.random.split(key, 7)

    x = jax.random.normal(kx, (B, 1, L), dtype=jnp.float32)

    # Deterministic synthetic parameters (shapes from the module __init__).
    wconv = jax.random.normal(k1, (C_OUT, K), dtype=jnp.float32) * 0.5   # Conv1d.weight (C_out,1,K) squeezed
    bconv = jax.random.normal(k2, (C_OUT,), dtype=jnp.float32) * 0.1     # Conv1d.bias
    w1 = jax.random.normal(k3, (F, 50), dtype=jnp.float32) * 0.2         # fc1.weight.T
    b1 = jax.random.normal(k4, (50,), dtype=jnp.float32) * 0.1           # fc1.bias
    w2 = jax.random.normal(k5, (50, OUT), dtype=jnp.float32) * 0.2       # fc2.weight.T
    b2 = jax.random.normal(k6, (OUT,), dtype=jnp.float32) * 0.1          # fc2.bias

    params = (wconv, bconv, w1, b1, w2, b2)

    out = cnn_tsnet_forward(x, params, kernel_size=K)
    out = jax.block_until_ready(out)

    ref = reference_forward(x, params, kernel_size=K)
    assert out.shape == (B, OUT)
    assert jnp.allclose(out, ref, rtol=1e-4, atol=1e-4), (out, ref)

    # TODO(synk): gradient hook (register_hook / get_activations_gradient) is a
    # training-time autograd feature with no forward-pass Pallas equivalent.
    print("KERNEL_OK")
</pallas_src>

<mosaic_0001>
module attributes {stable_mosaic.version = 11 : i64} {
  func.func @_kernel(%arg0: i32, %arg1: memref<8x16xf32, #tpu.memory_space<vmem>>, %arg2: memref<16x128xf32, #tpu.memory_space<vmem>>, %arg3: memref<1x128xf32, #tpu.memory_space<vmem>>, %arg4: memref<128x128xf32, #tpu.memory_space<vmem>>, %arg5: memref<1x128xf32, #tpu.memory_space<vmem>>, %arg6: memref<128x128xf32, #tpu.memory_space<vmem>>, %arg7: memref<1x128xf32, #tpu.memory_space<vmem>>, %arg8: memref<8x128xf32, #tpu.memory_space<vmem>>) attributes {dimension_semantics = [#tpu.dimension_semantics<parallel>], iteration_bounds = array<i64: 1>, scalar_prefetch = 0 : i64, scratch_operands = 0 : i64, tpu.core_type = #tpu.core_type<tc>, window_params = [{transform_indices = @transform_0, window_bounds = array<i64: 8, 16>}, {pipeline_mode = #tpu.pipeline_mode<synchronous>, transform_indices = @transform_1, window_bounds = array<i64: 16, 128>}, {pipeline_mode = #tpu.pipeline_mode<synchronous>, transform_indices = @transform_2, window_bounds = array<i64: 1, 128>}, {pipeline_mode = #tpu.pipeline_mode<synchronous>, transform_indices = @transform_3, window_bounds = array<i64: 128, 128>}, {pipeline_mode = #tpu.pipeline_mode<synchronous>, transform_indices = @transform_4, window_bounds = array<i64: 1, 128>}, {pipeline_mode = #tpu.pipeline_mode<synchronous>, transform_indices = @transform_5, window_bounds = array<i64: 128, 128>}, {pipeline_mode = #tpu.pipeline_mode<synchronous>, transform_indices = @transform_6, window_bounds = array<i64: 1, 128>}, {transform_indices = @transform_7, window_bounds = array<i64: 8, 128>}]} {
    %c0 = arith.constant 0 : index
    %c0_0 = arith.constant 0 : index
    %0 = vector.load %arg1[%c0, %c0_0] : memref<8x16xf32, #tpu.memory_space<vmem>>, vector<8x16xf32>
    %c0_1 = arith.constant 0 : index
    %c0_2 = arith.constant 0 : index
    %1 = vector.load %arg2[%c0_1, %c0_2] : memref<16x128xf32, #tpu.memory_space<vmem>>, vector<16x128xf32>
    %cst = arith.constant dense<0.000000e+00> : vector<8x128xf32>
    %2 = tpu.matmul %0, %1, %cst {dimension_numbers = #tpu.dot_dimension_numbers<[1], [0], [0], [1], [0, 0, 1, 1], [], []>} : vector<8x16xf32>, vector<16x128xf32>, vector<8x128xf32> -> vector<8x128xf32>
    %c0_3 = arith.constant 0 : index
    %c0_4 = arith.constant 0 : index
    %3 = vector.load %arg3[%c0_3, %c0_4] : memref<1x128xf32, #tpu.memory_space<vmem>>, vector<1x128xf32>
    %4 = vector.broadcast %3 : vector<1x128xf32> to vector<8x128xf32>
    %5 = arith.addf %2, %4 : vector<8x128xf32>
    %cst_5 = arith.constant 0.000000e+00 : f32
    %6 = vector.broadcast %cst_5 : f32 to vector<8x128xf32>
    %7 = arith.maximumf %5, %6 : vector<8x128xf32>
    %c0_6 = arith.constant 0 : index
    %c0_7 = arith.constant 0 : index
    %8 = vector.load %arg4[%c0_6, %c0_7] : memref<128x128xf32, #tpu.memory_space<vmem>>, vector<128x128xf32>
    %cst_8 = arith.constant dense<0.000000e+00> : vector<8x128xf32>
    %9 = tpu.matmul %7, %8, %cst_8 {dimension_numbers = #tpu.dot_dimension_numbers<[1], [0], [0], [1], [0, 0, 1, 1], [], []>} : vector<8x128xf32>, vector<128x128xf32>, vector<8x128xf32> -> vector<8x128xf32>
    %c0_9 = arith.constant 0 : index
    %c0_10 = arith.constant 0 : index
    %10 = vector.load %arg5[%c0_9, %c0_10] : memref<1x128xf32, #tpu.memory_space<vmem>>, vector<1x128xf32>
    %11 = vector.broadcast %10 : vector<1x128xf32> to vector<8x128xf32>
    %12 = arith.addf %9, %11 : vector<8x128xf32>
    %cst_11 = arith.constant 0.000000e+00 : f32
    %13 = vector.broadcast %cst_11 : f32 to vector<8x128xf32>
    %14 = arith.maximumf %12, %13 : vector<8x128xf32>
    %c0_12 = arith.constant 0 : index
    %c0_13 = arith.constant 0 : index
    %15 = vector.load %arg6[%c0_12, %c0_13] : memref<128x128xf32, #tpu.memory_space<vmem>>, vector<128x128xf32>
    %cst_14 = arith.constant dense<0.000000e+00> : vector<8x128xf32>
    %16 = tpu.matmul %14, %15, %cst_14 {dimension_numbers = #tpu.dot_dimension_numbers<[1], [0], [0], [1], [0, 0, 1, 1], [], []>} : vector<8x128xf32>, vector<128x128xf32>, vector<8x128xf32> -> vector<8x128xf32>
    %c0_15 = arith.constant 0 : index
    %c0_16 = arith.constant 0 : index
    %17 = vector.load %arg7[%c0_15, %c0_16] : memref<1x128xf32, #tpu.memory_space<vmem>>, vector<1x128xf32>
    %18 = vector.broadcast %17 : vector<1x128xf32> to vector<8x128xf32>
    %19 = arith.addf %16, %18 : vector<8x128xf32>
    %c0_17 = arith.constant 0 : index
    %c0_18 = arith.constant 0 : index
    %20 = vector.load %arg8[%c0_17, %c0_18] : memref<8x128xf32, #tpu.memory_space<vmem>>, vector<8x128xf32>
    tpu.vector_store %arg8[%c0_17, %c0_18], %19 {strides = array<i32>} : memref<8x128xf32, #tpu.memory_space<vmem>>, vector<8x128xf32>,
    return
  }
  func.func @transform_0(%arg0: i32) -> (i32, i32) {
    %c0_i32 = arith.constant 0 : i32
    %c0_i32_0 = arith.constant 0 : i32
    return %arg0, %c0_i32 : i32, i32
  }
  func.func @transform_1(%arg0: i32) -> (i32, i32) {
    %c0_i32 = arith.constant 0 : i32
    %c0_i32_0 = arith.constant 0 : i32
    %c0_i32_1 = arith.constant 0 : i32
    return %c0_i32, %c0_i32_0 : i32, i32
  }
  func.func @transform_2(%arg0: i32) -> (i32, i32) {
    %c0_i32 = arith.constant 0 : i32
    %c0_i32_0 = arith.constant 0 : i32
    %c0_i32_1 = arith.constant 0 : i32
    return %c0_i32, %c0_i32_0 : i32, i32
  }
  func.func @transform_3(%arg0: i32) -> (i32, i32) {
    %c0_i32 = arith.constant 0 : i32
    %c0_i32_0 = arith.constant 0 : i32
    %c0_i32_1 = arith.constant 0 : i32
    return %c0_i32, %c0_i32_0 : i32, i32
  }
  func.func @transform_4(%arg0: i32) -> (i32, i32) {
    %c0_i32 = arith.constant 0 : i32
    %c0_i32_0 = arith.constant 0 : i32
    %c0_i32_1 = arith.constant 0 : i32
    return %c0_i32, %c0_i32_0 : i32, i32
  }
  func.func @transform_5(%arg0: i32) -> (i32, i32) {
    %c0_i32 = arith.constant 0 : i32
    %c0_i32_0 = arith.constant 0 : i32
    %c0_i32_1 = arith.constant 0 : i32
    return %c0_i32, %c0_i32_0 : i32, i32
  }
  func.func @transform_6(%arg0: i32) -> (i32, i32) {
    %c0_i32 = arith.constant 0 : i32
    %c0_i32_0 = arith.constant 0 : i32
    %c0_i32_1 = arith.constant 0 : i32
    return %c0_i32, %c0_i32_0 : i32, i32
  }
  func.func @transform_7(%arg0: i32) -> (i32, i32) {
    %c0_i32 = arith.constant 0 : i32
    %c0_i32_0 = arith.constant 0 : i32
    return %arg0, %c0_i32 : i32, i32
  }
}

</mosaic_0001>

<bundles_post_ra>
// kernel: tpu_custom_call.1
= control target key start
LH: loop header
LB: loop body
LE: loop exit
PB: predicated region body
PF: predicated region fallthrough
CT: control target
= control target key end

     0   :  { %12 = vsyncpa [#allocation3], 0  ;;  %s431_s0 = inlined_call_operand.hbm [shape: f32[8,16], index: 0, kind: input, shape index: {}]   ;;  %s432_s1 = inlined_call_operand.hbm [shape: f32[16,128], index: 1, kind: input, shape index: {}]   ;;  %s433_s2 = inlined_call_operand.vmem [shape: f32[1,128], index: 2, kind: input, shape index: {}]   ;;  %s434_s3 = inlined_call_operand.hbm [shape: f32[128,128], index: 3, kind: input, shape index: {}]   ;;  %s435_s4 = inlined_call_operand.vmem [shape: f32[1,128], index: 4, kind: input, shape index: {}]   ;;  %s436_s5 = inlined_call_operand.hbm [shape: f32[128,128], index: 5, kind: input, shape index: {}]   ;;  %s437_s6 = inlined_call_operand.vmem [shape: f32[1,128], index: 6, kind: input, shape index: {}]   ;;  %s438_s7 = inlined_call_operand.hbm [shape: f32[8,128], index: 7, kind: output, shape index: {}]  }
   0x1   :  { %13 = vsyncpa [#allocation6], 0 }
   0x2   :  { %14 = vsyncpa [#allocation9], 0  ;;  %s31_s26 = sshll.u32 %s432_s1, 4  ;;  %s32_s26 = int_to_ptr.hbm [resolvable:$true] %s31_s26 }
   0x3   :  { %15 = vsyncpa [#allocation4], 0  ;;  %s360_s27 = smov [#allocation5]   ;;  %s21_s8 = sshll.u32 %s431_s0, 4  ;;  %s22_s8 = int_to_ptr.hbm [resolvable:$true] %s21_s8 }
   0x4   :  { %s33_s28 = sshll.u32 %s360_s27, 4  ;;  %s361_s9 = smov 128   ;;  %s34_s28 = int_to_ptr.vmem [resolvable:$true] %s33_s28 }
   0x5   :  { %s362_s10 = smov 8   ;;  %s363_s11 = smov [#allocation2]  }
   0x6   :  { %39 = dma.hbm_to_vmem [thread:$0]  %s32_s26, 256, %s34_s28, [#allocation6], %s361_s9, %s361_s9, %s362_s10  }
   0x7   :  { %s23_s12 = sshll.u32 %s363_s11, 4  ;;  %s46_s15 = sshll.u32 %s434_s3, 4  ;;  %s24_s12 = int_to_ptr.vmem [resolvable:$true] %s23_s12  ;;  %s47_s15 = int_to_ptr.hbm [resolvable:$true] %s46_s15 }
   0x8   :  { %26 = dma.hbm_to_vmem [thread:$0]  %s22_s8, 128, %s24_s12, [#allocation3]  }
   0x9   :  { %s61_s17 = sshll.u32 %s436_s5, 4  ;;  %s364_s18 = smov [#allocation7]   ;;  %s62_s17 = int_to_ptr.hbm [resolvable:$true] %s61_s17 }
   0xa   :  { %s48_s19 = sshll.u32 %s364_s18, 4  ;;  %s365_s0 = smov [#allocation8]   ;;  %s49_s19 = int_to_ptr.vmem [resolvable:$true] %s48_s19 }
   0xb   :  { %54 = dma.hbm_to_vmem [thread:$0]  %s47_s15, 2048, %s49_s19, [#allocation6], %s361_s9, %s361_s9, %s362_s10  }
   0xc   :  { %s63_s20 = sshll.u32 %s365_s0, 4  ;;  %s64_s20 = int_to_ptr.vmem [resolvable:$true] %s63_s20 }
   0xd   :  { %69 = dma.hbm_to_vmem [thread:$0]  %s62_s17, 2048, %s64_s20, [#allocation9], %s361_s9, %s361_s9, %s362_s10  }
   0xe   :  { %352 = dma.done.wait [#allocation3], 128  }
   0xf   :  { %353 = vsyncadd [#allocation3], 4294967168 }
  0x10   :  { %354 = dma.done.wait [#allocation6], 2304  }
  0x11   :  { %355 = vsyncadd [#allocation6], 4294964992 }
  0x12   :  { %356 = dma.done.wait [#allocation9], 2048  }
  0x13   :  { %357 = vsyncadd [#allocation9], 4294965248  ;;  %v90_v0 = vld [vmem:[#allocation5 + $0x8] sm:$0xff]  ;;  %v89_v1 = vld [vmem:[#allocation5] sm:$0xff]  ;;  %vm95_vm0 = vcmask 130048   ;;  %s366_s24 = smov [#allocation10]  }
  0x14   :  { %113 = vmatpush.msra.mxu0 %v90_v0  ;;  %v88_v2 = vld [vmem:[#allocation2] sm:$0xff]  ;;  %v135_v3 = vld [vmem:[#allocation7 + $0x78] sm:$0xff]  ;;  %v134_v4 = vld [vmem:[#allocation7 + $0x70] sm:$0xff]  ;;  %s207_s25 = sshll.u32 %s366_s24, 4  ;;  %s209_s28 = sshll.u32 %s438_s7, 4  ;;  %s208_s25 = int_to_ptr.vmem [resolvable:$true] %s207_s25  ;;  %s210_s28 = int_to_ptr.hbm [resolvable:$true] %s209_s28 }
  0x15   :  { %140 = vmatpush.msra.mxu1 %v135_v3  ;;  %v133_v5 = vld [vmem:[#allocation7 + $0x68] sm:$0xff]  ;;  %v132_v6 = vld [vmem:[#allocation7 + $0x60] sm:$0xff]  ;;  %v131_v7 = vld [vmem:[#allocation7 + $0x58] sm:$0xff] }
  0x16   :  { %114 = vmatpush.msra.mxu0 %v89_v1  ;;  %v130_v8 = vld [vmem:[#allocation7 + $0x50] sm:$0xff]  ;;  %v129_v9 = vld [vmem:[#allocation7 + $0x48] sm:$0xff]  ;;  %v128_v10 = vld [vmem:[#allocation7 + $0x40] sm:$0xff] }
  0x17   :  { %221 = vmatmul.msk.f32.vlgmr.msra.gmra.mxu0 %vm95_vm0, %v88_v2  ;;  %141 = vmatpush.msra.mxu1 %v134_v4  ;;  %v127_v11 = vld [vmem:[#allocation7 + $0x38] sm:$0xff]  ;;  %v126_v12 = vld [vmem:[#allocation7 + $0x30] sm:$0xff]  ;;  %v125_v13 = vld [vmem:[#allocation7 + $0x28] sm:$0xff] }
  0x18   :  { %v124_v14 = vld [vmem:[#allocation7 + $0x20] sm:$0xff]  ;;  %v123_v15 = vld [vmem:[#allocation7 + $0x18] sm:$0xff]  ;;  %v122_v16 = vld [vmem:[#allocation7 + $0x10] sm:$0xff] }
  0x19   :  { %142 = vmatpush.msra.mxu1 %v133_v5  ;;  %v121_v17 = vld [vmem:[#allocation7 + $0x8] sm:$0xff]  ;;  %v120_v18 = vld [vmem:[#allocation7] sm:$0xff]  ;;  %v176_v19 = vld [vmem:[#allocation8 + $0x78] sm:$0xff] }
  0x1a   :  { %v175_v20 = vld [vmem:[#allocation8 + $0x70] sm:$0xff]  ;;  %181 = vmatpush.msra.mxu2 %v176_v19  ;;  %v174_v21 = vld [vmem:[#allocation8 + $0x68] sm:$0xff]  ;;  %v173_v22 = vld [vmem:[#allocation8 + $0x60] sm:$0xff] }
  0x1b   :  { %143 = vmatpush.msra.mxu1 %v132_v6  ;;  %v172_v23 = vld [vmem:[#allocation8 + $0x58] sm:$0xff]  ;;  %v171_v24 = vld [vmem:[#allocation8 + $0x50] sm:$0xff]  ;;  %v170_v25 = vld [vmem:[#allocation8 + $0x48] sm:$0xff] }
  0x1c   :  { %182 = vmatpush.msra.mxu2 %v175_v20  ;;  %v169_v26 = vld [vmem:[#allocation8 + $0x40] sm:$0xff]  ;;  %v168_v27 = vld [vmem:[#allocation8 + $0x38] sm:$0xff]  ;;  %v167_v28 = vld [vmem:[#allocation8 + $0x30] sm:$0xff] }
  0x1d   :  { %144 = vmatpush.msra.mxu1 %v131_v7  ;;  %v166_v29 = vld [vmem:[#allocation8 + $0x28] sm:$0xff]  ;;  %v165_v30 = vld [vmem:[#allocation8 + $0x20] sm:$0xff]  ;;  %v164_v31 = vld [vmem:[#allocation8 + $0x18] sm:$0xff] }
  0x1e   :  { %183 = vmatpush.msra.mxu2 %v174_v21  ;;  %v229_v32 = vld [vmem:[%s433_s2] ss:$0 sm:$0xff]  ;;  %v163_v36 = vld [vmem:[#allocation8 + $0x10] sm:$0xff]  ;;  %v161_v38 = vld [vmem:[#allocation8] sm:$0xff] }
  0x1f   :  { %145 = vmatpush.msra.mxu1 %v130_v8  ;;  %v162_v37 = vld [vmem:[#allocation8 + $0x8] sm:$0xff] }
  0x20   :  { %184 = vmatpush.msra.mxu2 %v173_v22  ;;  %v230_v39 = vld [vmem:[%s435_s4] ss:$0 sm:$0xff] }
  0x21   :  { %146 = vmatpush.msra.mxu1 %v129_v9  ;;  %v231_v43 = vld [vmem:[%s437_s6] ss:$0 sm:$0xff] }
  0x22   :  { %185 = vmatpush.msra.mxu2 %v172_v23 }
  0x23   :  { %147 = vmatpush.msra.mxu1 %v128_v10 }
  0x24   :  { %186 = vmatpush.msra.mxu2 %v171_v24 }
  0x25   :  { %148 = vmatpush.msra.mxu1 %v127_v11 }
  0x26   :  { %187 = vmatpush.msra.mxu2 %v170_v25 }
  0x27   :  { %149 = vmatpush.msra.mxu1 %v126_v12 }
  0x28   :  { %188 = vmatpush.msra.mxu2 %v169_v26 }
  0x29   :  { %150 = vmatpush.msra.mxu1 %v125_v13 }
  0x2a   :  { %189 = vmatpush.msra.mxu2 %v168_v27 }
  0x2b   :  { %151 = vmatpush.msra.mxu1 %v124_v14 }
  0x2c   :  { %190 = vmatpush.msra.mxu2 %v167_v28 }
  0x2d   :  { %152 = vmatpush.msra.mxu1 %v123_v15 }
  0x2e   :  { %191 = vmatpush.msra.mxu2 %v166_v29 }
  0x2f   :  { %153 = vmatpush.msra.mxu1 %v122_v16 }
  0x30   :  { %192 = vmatpush.msra.mxu2 %v165_v30 }
  0x31   :  { %154 = vmatpush.msra.mxu1 %v121_v17 }
  0x32   :  { %193 = vmatpush.msra.mxu2 %v164_v31 }
  0x33   :  { %155 = vmatpush.msra.mxu1 %v120_v18 }
  0x34   :  { %194 = vmatpush.msra.mxu2 %v163_v36 }
  0x36   :  { %195 = vmatpush.msra.mxu2 %v162_v37 }
  0x38   :  { %196 = vmatpush.msra.mxu2 %v161_v38 }
  0x94   :  { %v116_v33 = vpop.f32.mrf.mxu0 }
  0x95   :  { %v117_v34 = vadd.f32 %v229_v32, %v116_v33 }
  0x97   :  { %v119_v35 = vmax.f32 %v117_v34, 0.0 }
  0x99   :  { %156 = vmatmul.f32.vlgmr.msra.gmra.mxu1 %v119_v35 }
 0x116   :  { %v157_v40 = vpop.f32.mrf.mxu1 }
 0x117   :  { %v158_v41 = vadd.f32 %v230_v39, %v157_v40 }
 0x119   :  { %v160_v42 = vmax.f32 %v158_v41, 0.0 }
 0x11b   :  { %197 = vmatmul.f32.vlgmr.msra.gmra.mxu2 %v160_v42 }
 0x19e   :  { %v198_v44 = vpop.f32.mrf.mxu2 }
 0x19f   :  { %v199_v45 = vadd.f32 %v231_v43, %v198_v44 }
 0x1a1   :  { %201 = vst [vmem:[#allocation10] sm:$0xff] %v199_v45 }
 0x1a2   :  { %212 = dma.vmem_to_hbm [thread:$0]  %s208_s25, 128, %s210_s28, [#allocation4]  }
 0x1a3   :  { %358 = dma.done.wait [#allocation4], 128  }
 0x1a4   :  { %359 = vsyncadd [#allocation4], 4294967168 }
 0x1a5   :  { %217 = vsyncpa [#allocation3], 1 }
 0x1a6   :  { %218 = vsyncpa [#allocation6], 1 }
 0x1a7   :  { %219 = vsyncpa [#allocation9], 1 }
 0x1a8   :  { %220 = vsyncpa [#allocation4], 1 }

</bundles_post_ra>
